<compile_context>
chip_gen: v7x
topology: tpu7x:2x2x1
jax: 0.10.0
libtpu: 0.0.40
codegen_flags: <defaults>
</compile_context>

<pallas_src>
import math

import jax
import jax.numpy as jnp
from jax.experimental import pallas as pl
from jax.experimental.pallas import tpu as pltpu

# Tile caps (lane-aligned).  Tiles are chosen as divisors of the 128-padded
# dims so the pre-padded weight never needs re-padding per call.
_TM_CAP = 512
_TN_CAP = 512
_TK_CAP = 2048

# Explicit scoped-VMEM budget: > our worst-case ~19 MiB/step footprint,
# < v7x's 64 MiB physical VMEM, far under v5e/v6e's 128 MiB.
_VMEM_LIMIT_BYTES = 48 * 1024 * 1024

# Below this many MACs the XLA fused matmul beats pallas_call dispatch.
_JNP_FALLBACK_MACS = 128 * 128 * 128


def _round_up(x, m):
    return ((x + m - 1) // m) * m


def _sublane_multiple(dtype):
    # 8 rows/vreg for 32-bit, 16 for bf16, 32 for int8 (sublane packing).
    return max(8, 32 // jnp.dtype(dtype).itemsize)


def _choose_kn_tiles(in_size, out_size):
    """Tile sizes along K/N chosen from the padded-to-128 dims only, so the
    weight/bias padding can be done once at init and always matches."""
    kp = _round_up(in_size, 128)
    np_ = _round_up(out_size, 128)
    if kp <= _TK_CAP:
        tk = kp
    else:
        tk = max(t for t in (2048, 1024, 512, 256, 128) if kp % t == 0)
    if np_ <= _TN_CAP:
        tn = np_
    else:
        tn = max(t for t in (512, 384, 256, 128) if np_ % t == 0)
    return tk, tn, kp, np_


# ---------------------------------------------------------------------------
# Kernels
# ---------------------------------------------------------------------------
def _lv_kernel_single_k(x_ref, w_ref, b_ref, o_ref):
    # Whole K reduction in one grid step: no accumulator scratch, no RMW.
    acc = jnp.dot(x_ref[...], w_ref[...], preferred_element_type=jnp.float32)
    o_ref[...] = (acc + b_ref[...].astype(jnp.float32)).astype(o_ref.dtype)


def _lv_kernel_multi_k(x_ref, w_ref, b_ref, o_ref, acc_ref):
    # x_ref: (tm, tk), w_ref: (tk, tn), b_ref: (1, tn), o_ref/acc_ref: (tm, tn)
    k = pl.program_id(2)

    @pl.when(k == 0)
    def _():
        # Bias folded into the accumulator init -> no add in the epilogue.
        acc_ref[...] = jnp.broadcast_to(
            b_ref[...].astype(jnp.float32), acc_ref.shape
        )

    acc_ref[...] += jnp.dot(
        x_ref[...], w_ref[...], preferred_element_type=jnp.float32
    )

    @pl.when(k == pl.num_programs(2) - 1)
    def _():
        o_ref[...] = acc_ref[...].astype(o_ref.dtype)


# ---------------------------------------------------------------------------
# Params
# ---------------------------------------------------------------------------
def prepare_linear_view_params(weight_t, bias):
    """One-time (init / checkpoint-load) padding of the pre-transposed weight
    (input_size, output_size) and bias to 128-multiples.  The K-tail padding
    MUST be zero (it participates in the reduction); N padding is sliced off
    the output."""
    in_size, out_size = weight_t.shape
    _, _, kp, np_ = _choose_kn_tiles(in_size, out_size)
    if (kp, np_) != (in_size, out_size):
        weight_t = jnp.pad(weight_t, ((0, kp - in_size), (0, np_ - out_size)))
        bias = jnp.pad(bias, (0, np_ - out_size))
    return weight_t, bias


def init_linear_view_params(key, input_size, output_view, dtype=jnp.float32):
    """nn.Linear-style init (uniform +-1/sqrt(in)), returned pre-transposed
    to (input_size, output_size) and pre-padded for the kernel."""
    output_size = math.prod(output_view)
    kw, kb = jax.random.split(key)
    bound = 1.0 / math.sqrt(input_size)
    weight_t = jax.random.uniform(
        kw, (input_size, output_size), dtype=dtype, minval=-bound, maxval=bound
    )
    bias = jax.random.uniform(
        kb, (output_size,), dtype=dtype, minval=-bound, maxval=bound
    )
    return prepare_linear_view_params(weight_t, bias)


# ---------------------------------------------------------------------------
# Forward
# ---------------------------------------------------------------------------
def linear_view(x, weight_t, bias, output_view, *, force_pallas=False):
    """Pallas implementation of LinearView.forward.

    x:        (B, input_size)
    weight_t: (input_size, output_size) or pre-padded (Kp, Np)  [preferred]
    bias:     (output_size,) or pre-padded (Np,)
    """
    B, in_size = x.shape
    out_size = math.prod(output_view)
    tk, tn, kp, np_ = _choose_kn_tiles(in_size, out_size)

    # ---- tiny-shape fallback: plain jnp beats pallas_call dispatch here ----
    if not force_pallas and B * in_size * out_size <= _JNP_FALLBACK_MACS:
        w = weight_t if weight_t.shape == (in_size, out_size) else \
            weight_t[:in_size, :out_size]
        b = bias if bias.shape == (out_size,) else bias[:out_size]
        y = jnp.dot(x, w, preferred_element_type=jnp.float32)
        y = (y + b.astype(jnp.float32)).astype(x.dtype)
        return y.reshape((-1,) + tuple(output_view))

    # ---- params: prefer pre-padded (free); fall back to per-call pad -------
    if weight_t.shape == (kp, np_):
        w_p = weight_t
        b_p = bias if bias.shape == (np_,) else jnp.pad(bias, (0, np_ - out_size))
    else:
        assert weight_t.shape == (in_size, out_size)
        w_p = jnp.pad(weight_t, ((0, kp - in_size), (0, np_ - out_size)))
        b_p = jnp.pad(bias, (0, np_ - out_size))
    b2d = b_p.reshape(1, np_)

    # ---- M tile: dtype-aware sublane rounding + megacore 2-block heuristic --
    sub = _sublane_multiple(x.dtype)
    tm = min(_TM_CAP, _round_up(B, sub))
    mp = _round_up(B, tm)
    n_blocks_n = np_ // tn
    if n_blocks_n == 1 and mp // tm == 1 and B >= 2 * sub:
        # Both parallel axes single-block -> split M so v7x's 2nd core has work.
        tm2 = _round_up((B + 1) // 2, sub)
        mp2 = _round_up(B, tm2)
        if mp2 // tm2 >= 2:
            tm, mp = tm2, mp2

    x_p = x
    if mp != B or kp != in_size:
        x_p = jnp.pad(x, ((0, mp - B), (0, kp - in_size)))  # K pad must be zero

    k_blocks = kp // tk
    m_blocks = mp // tm
    n_blocks = np_ // tn

    x_it = jnp.dtype(x.dtype).itemsize
    w_it = jnp.dtype(w_p.dtype).itemsize
    b_it = jnp.dtype(b_p.dtype).itemsize
    cost = pl.CostEstimate(
        flops=2 * mp * np_ * kp,
        transcendentals=0,
        # Actual HBM traffic including re-streaming: x is re-read once per N
        # block, W once per M block.
        bytes_accessed=(mp * kp * x_it * n_blocks
                        + kp * np_ * w_it * m_blocks
                        + np_ * b_it * m_blocks
                        + mp * np_ * x_it),
    )

    if k_blocks == 1:
        y = pl.pallas_call(
            _lv_kernel_single_k,
            out_shape=jax.ShapeDtypeStruct((mp, np_), x.dtype),
            grid_spec=pltpu.PrefetchScalarGridSpec(
                num_scalar_prefetch=0,
                grid=(m_blocks, n_blocks),
                in_specs=[
                    pl.BlockSpec((tm, tk), lambda i, j: (i, 0)),
                    pl.BlockSpec((tk, tn), lambda i, j: (0, j)),
                    pl.BlockSpec((1, tn), lambda i, j: (0, j)),
                ],
                out_specs=pl.BlockSpec((tm, tn), lambda i, j: (i, j)),
            ),
            compiler_params=pltpu.CompilerParams(
                dimension_semantics=("parallel", "parallel"),
                vmem_limit_bytes=_VMEM_LIMIT_BYTES,
            ),
            cost_estimate=cost,
        )(x_p, w_p, b2d)
    else:
        y = pl.pallas_call(
            _lv_kernel_multi_k,
            out_shape=jax.ShapeDtypeStruct((mp, np_), x.dtype),
            grid_spec=pltpu.PrefetchScalarGridSpec(
                num_scalar_prefetch=0,
                grid=(m_blocks, n_blocks, k_blocks),
                in_specs=[
                    pl.BlockSpec((tm, tk), lambda i, j, k: (i, k)),
                    pl.BlockSpec((tk, tn), lambda i, j, k: (k, j)),
                    pl.BlockSpec((1, tn), lambda i, j, k: (0, j)),
                ],
                out_specs=pl.BlockSpec((tm, tn), lambda i, j, k: (i, j)),
                scratch_shapes=[pltpu.VMEM((tm, tn), jnp.float32)],
            ),
            compiler_params=pltpu.CompilerParams(
                dimension_semantics=("parallel", "parallel", "arbitrary"),
                vmem_limit_bytes=_VMEM_LIMIT_BYTES,
            ),
            cost_estimate=cost,
        )(x_p, w_p, b2d)

    if mp != B or np_ != out_size:
        y = y[:B, :out_size]

    # .view(-1, *output_view) -- pure-metadata reshape.
    return y.reshape((-1,) + tuple(output_view))


if __name__ == "__main__":
    key = jax.random.PRNGKey(0)
    k1, k2, k3, k4, k5, k6 = jax.random.split(key, 6)

    # Case 1: tiny, unaligned shapes. Auto path takes the plain-jnp fallback;
    # force_pallas=True exercises the padded single-tile kernel path.
    B1, in1, ov1 = 2, 32, (4, 8)            # output_size = 32
    o1 = math.prod(ov1)
    x1 = jax.random.normal(k1, (B1, in1), dtype=jnp.float32)
    w1, b1 = init_linear_view_params(k2, in1, ov1)
    ref1 = (x1 @ w1[:in1, :o1] + b1[:o1]).reshape((-1,) + ov1)
    y1a = jax.block_until_ready(linear_view(x1, w1, b1, ov1))
    y1b = jax.block_until_ready(linear_view(x1, w1, b1, ov1, force_pallas=True))
    assert y1a.shape == (B1,) + ov1 and y1b.shape == (B1,) + ov1
    assert jnp.allclose(y1a, ref1, atol=1e-5, rtol=1e-5)
    assert jnp.allclose(y1b, ref1, atol=1e-5, rtol=1e-5)

    # Case 2: single-K-step kernel (K fits one tile), M axis split into two
    # blocks by the megacore heuristic (grid = (2, 1), tm=64, tn=512, tk=1024).
    B2, in2, ov2 = 128, 1024, (4, 128)      # output_size = 512
    x2 = jax.random.normal(k3, (B2, in2), dtype=jnp.float32)
    w2, b2 = init_linear_view_params(k4, in2, ov2)
    y2 = jax.block_until_ready(linear_view(x2, w2, b2, ov2))
    ref2 = (x2 @ w2 + b2).reshape((-1,) + ov2)
    assert y2.shape == (B2,) + ov2
    assert jnp.allclose(y2, ref2, atol=1e-4, rtol=1e-4)

    # Case 3: multi-K-step kernel (K > tk cap -> 3-D grid with f32 accumulator
    # and bias folded into the k==0 init; grid = (2, 1, 2)).
    B3, in3, ov3 = 256, 4096, (2, 256)      # output_size = 512
    x3 = jax.random.normal(k5, (B3, in3), dtype=jnp.float32)
    w3, b3 = init_linear_view_params(k6, in3, ov3)
    y3 = jax.block_until_ready(linear_view(x3, w3, b3, ov3))
    ref3 = (x3 @ w3 + b3).reshape((-1,) + ov3)
    assert y3.shape == (B3,) + ov3
    assert jnp.allclose(y3, ref3, atol=1e-3, rtol=1e-3)

    print("KERNEL_OK")
</pallas_src>

<mosaic_0001>
module attributes {stable_mosaic.version = 11 : i64} {
  func.func @_lv_kernel_single_k(%arg0: i32, %arg1: i32, %arg2: memref<8x128xf32, #tpu.memory_space<vmem>>, %arg3: memref<128x128xf32, #tpu.memory_space<vmem>>, %arg4: memref<1x128xf32, #tpu.memory_space<vmem>>, %arg5: memref<8x128xf32, #tpu.memory_space<vmem>>) attributes {dimension_semantics = [#tpu.dimension_semantics<parallel>, #tpu.dimension_semantics<parallel>], iteration_bounds = array<i64: 1, 1>, scalar_prefetch = 0 : i64, scratch_operands = 0 : i64, tpu.core_type = #tpu.core_type<tc>, window_params = [{transform_indices = @transform_0, window_bounds = array<i64: 8, 128>}, {transform_indices = @transform_1, window_bounds = array<i64: 128, 128>}, {transform_indices = @transform_2, window_bounds = array<i64: 1, 128>}, {transform_indices = @transform_3, window_bounds = array<i64: 8, 128>}]} {
    %c0 = arith.constant 0 : index
    %c0_0 = arith.constant 0 : index
    %0 = vector.load %arg2[%c0, %c0_0] : memref<8x128xf32, #tpu.memory_space<vmem>>, vector<8x128xf32>
    %c0_1 = arith.constant 0 : index
    %c0_2 = arith.constant 0 : index
    %1 = vector.load %arg3[%c0_1, %c0_2] : memref<128x128xf32, #tpu.memory_space<vmem>>, vector<128x128xf32>
    %cst = arith.constant dense<0.000000e+00> : vector<8x128xf32>
    %2 = tpu.matmul %0, %1, %cst {dimension_numbers = #tpu.dot_dimension_numbers<[1], [0], [0], [1], [0, 0, 1, 1], [], []>} : vector<8x128xf32>, vector<128x128xf32>, vector<8x128xf32> -> vector<8x128xf32>
    %c0_3 = arith.constant 0 : index
    %c0_4 = arith.constant 0 : index
    %3 = vector.load %arg4[%c0_3, %c0_4] : memref<1x128xf32, #tpu.memory_space<vmem>>, vector<1x128xf32>
    %4 = vector.broadcast %3 : vector<1x128xf32> to vector<8x128xf32>
    %5 = arith.addf %2, %4 : vector<8x128xf32>
    %c0_5 = arith.constant 0 : index
    %c0_6 = arith.constant 0 : index
    %6 = vector.load %arg5[%c0_5, %c0_6] : memref<8x128xf32, #tpu.memory_space<vmem>>, vector<8x128xf32>
    tpu.vector_store %arg5[%c0_5, %c0_6], %5 {strides = array<i32>} : memref<8x128xf32, #tpu.memory_space<vmem>>, vector<8x128xf32>,
    return
  }
  func.func @transform_0(%arg0: i32, %arg1: i32) -> (i32, i32) {
    %c0_i32 = arith.constant 0 : i32
    %c0_i32_0 = arith.constant 0 : i32
    return %arg0, %c0_i32 : i32, i32
  }
  func.func @transform_1(%arg0: i32, %arg1: i32) -> (i32, i32) {
    %c0_i32 = arith.constant 0 : i32
    %c0_i32_0 = arith.constant 0 : i32
    return %c0_i32, %arg1 : i32, i32
  }
  func.func @transform_2(%arg0: i32, %arg1: i32) -> (i32, i32) {
    %c0_i32 = arith.constant 0 : i32
    %c0_i32_0 = arith.constant 0 : i32
    return %c0_i32, %arg1 : i32, i32
  }
  func.func @transform_3(%arg0: i32, %arg1: i32) -> (i32, i32) {
    %c0_i32 = arith.constant 0 : i32
    return %arg0, %arg1 : i32, i32
  }
}

</mosaic_0001>

<bundles_post_ra>
// kernel: tpu_custom_call.1
= control target key start
LH: loop header
LB: loop body
LE: loop exit
PB: predicated region body
PF: predicated region fallthrough
CT: control target
= control target key end

     0   :  { %8 = vsyncpa [#allocation3], 0  ;;  %s383_s0 = inlined_call_operand.hbm [shape: f32[8,128], index: 0, kind: input, shape index: {}]   ;;  %s384_s1 = inlined_call_operand.hbm [shape: f32[128,128], index: 1, kind: input, shape index: {}]   ;;  %s385_s2 = inlined_call_operand.vmem [shape: f32[1,128], index: 2, kind: input, shape index: {}]   ;;  %s386_s3 = inlined_call_operand.hbm [shape: f32[8,128], index: 3, kind: output, shape index: {}]  }
   0x1   :  { %9 = vsyncpa [#allocation6], 0 }
   0x2   :  { %10 = vsyncpa [#allocation4], 0  ;;  %s309_s12 = smov [#allocation2]   ;;  %s310_s14 = smov [#allocation5]  }
   0x3   :  { %s17_s13 = sshll.u32 %s309_s12, 4  ;;  %s26_s15 = sshll.u32 %s310_s14, 4  ;;  %s18_s13 = int_to_ptr.vmem [resolvable:$true] %s17_s13  ;;  %s337_s15 = int_to_ptr.vmem [resolvable:$true] %s26_s15 }
   0x4   :  { %s237_s18 = scalar_lea.hbm %s383_s0, 128 }
   0x5   :  { %p238_p0 = scmp.ne.s32.totalorder %s383_s0, %s237_s18  ;;  %p241_p1 = scmp.lt.u32.totalorder %s237_s18, %s383_s0 }
   0x7   :  { %p243_p2 = pnand %p241_p1, %p238_p0 }
   0x9   :  { %246 = shalt.err (!%p243_p2)
}
   0xa   :  { %s247_s23 = scalar_lea.vmem %s18_s13, 128  ;;  %p252_p4 = scmp.lt.s32.totalorder %s18_s13, %s18_s13 }
   0xb   :  { %p248_p3 = scmp.ne.s32.totalorder %s18_s13, %s247_s23  ;;  %p253_p5 = scmp.lt.s32.totalorder %s247_s23, %s247_s23 }
   0xd   :  { %p254_p6 = por %p253_p5, %p252_p4 }
   0xf   :  { %p255_p7 = pnand %p254_p6, %p248_p3 }
  0x11   :  { %258 = shalt.err (!%p255_p7)
}
  0x12   :  { %20 = dma.hbm_to_vmem [thread:$0]  %s383_s0, 128, %s18_s13, [#allocation3]  }
  0x13   :  { %s259_s28 = scalar_lea.hbm %s384_s1, 2048 }
  0x14   :  { %p260_p8 = scmp.ne.s32.totalorder %s384_s1, %s259_s28  ;;  %p263_p9 = scmp.lt.u32.totalorder %s259_s28, %s384_s1 }
  0x16   :  { %p265_p10 = pnand %p263_p9, %p260_p8 }
  0x18   :  { %268 = shalt.err (!%p265_p10)
}
  0x19   :  { %s269_s6 = scalar_lea.vmem %s337_s15, 2048  ;;  %p274_p12 = scmp.lt.s32.totalorder %s337_s15, %s337_s15 }
  0x1a   :  { %p270_p11 = scmp.ne.s32.totalorder %s337_s15, %s269_s6  ;;  %p275_p13 = scmp.lt.s32.totalorder %s269_s6, %s269_s6 }
  0x1c   :  { %p276_p0 = por %p275_p13, %p274_p12 }
  0x1e   :  { %p277_p1 = pnand %p276_p0, %p270_p11 }
  0x20   :  { %280 = shalt.err (!%p277_p1)
}
  0x21   :  { %s311_s0 = smov 128   ;;  %s312_s7 = smov 8  }
  0x22   :  { %32 = dma.hbm_to_vmem [thread:$0]  %s384_s1, 2048, %s337_s15, [#allocation6], %s311_s0, %s311_s0, %s312_s7  }
  0x23   :  { %303 = dma.done.wait [#allocation3], 128  }
  0x24   :  { %304 = vsyncadd [#allocation3], 4294967168 }
  0x25   :  { %305 = dma.done.wait [#allocation6], 2048  }
  0x26   :  { %306 = vsyncadd [#allocation6], 4294965248  ;;  %v313_v0 = vmov 0.0|0.0   ;;  %vm314_vm0 = vmmov 0   ;;  %v315_v1 = vmov 0.0   ;;  %v42_v2 = vld [vmem:[#allocation5] sm:$0xff] }
  0x27   :  { %205 = vmatprep.subr.bf16.mxu0 %v313_v0  ;;  %202 = vmatprep.mubr.msk.f32.mxu0 %vm314_vm0, %v315_v1  ;;  %v43_v3 = vld [vmem:[#allocation5 + $0x8] sm:$0xff]  ;;  %v44_v4 = vld [vmem:[#allocation5 + $0x10] sm:$0xff]  ;;  %v45_v6 = vld [vmem:[#allocation5 + $0x18] sm:$0xff]  ;;  %s316_s11 = smov [#allocation7]  }
  0x28   :  { %v206_v5 = vpack.c.bf16 %v43_v3, %v42_v2  ;;  %v209_v7 = vpack.c.bf16 %v45_v6, %v44_v4  ;;  %v46_v8 = vld [vmem:[#allocation5 + $0x20] sm:$0xff]  ;;  %v47_v9 = vld [vmem:[#allocation5 + $0x28] sm:$0xff]  ;;  %v48_v11 = vld [vmem:[#allocation5 + $0x30] sm:$0xff]  ;;  %s142_s12 = sshll.u32 %s316_s11, 4  ;;  %s143_s12 = int_to_ptr.vmem [resolvable:$true] %s142_s12 }
  0x29   :  { %v212_v10 = vpack.c.bf16 %v47_v9, %v46_v8  ;;  %v49_v12 = vld [vmem:[#allocation5 + $0x38] sm:$0xff]  ;;  %v50_v14 = vld [vmem:[#allocation5 + $0x40] sm:$0xff]  ;;  %v51_v15 = vld [vmem:[#allocation5 + $0x48] sm:$0xff]  ;;  %s281_s13 = scalar_lea.vmem %s143_s12, 128  ;;  %p286_p3 = scmp.lt.s32.totalorder %s143_s12, %s143_s12 }
  0x2a   :  { %207 = vmatpush3.bf16.msra.mxu0 %v206_v5  ;;  %v215_v13 = vpack.c.bf16 %v49_v12, %v48_v11  ;;  %v218_v16 = vpack.c.bf16 %v51_v15, %v50_v14  ;;  %v52_v17 = vld [vmem:[#allocation5 + $0x50] sm:$0xff]  ;;  %v53_v18 = vld [vmem:[#allocation5 + $0x58] sm:$0xff]  ;;  %v54_v20 = vld [vmem:[#allocation5 + $0x60] sm:$0xff]  ;;  %p282_p2 = scmp.ne.s32.totalorder %s143_s12, %s281_s13  ;;  %p287_p4 = scmp.lt.s32.totalorder %s281_s13, %s281_s13 }
  0x2b   :  { %208 = vmatprep.subr.bf16.mxu0 %v313_v0  ;;  %v221_v19 = vpack.c.bf16 %v53_v18, %v52_v17  ;;  %v55_v21 = vld [vmem:[#allocation5 + $0x68] sm:$0xff]  ;;  %v56_v23 = vld [vmem:[#allocation5 + $0x70] sm:$0xff]  ;;  %v57_v24 = vld [vmem:[#allocation5 + $0x78] sm:$0xff] }
  0x2c   :  { %v224_v22 = vpack.c.bf16 %v55_v21, %v54_v20  ;;  %v227_v25 = vpack.c.bf16 %v57_v24, %v56_v23  ;;  %v41_v26 = vld [vmem:[#allocation2] sm:$0xff]  ;;  %p288_p5 = por %p287_p4, %p286_p3 }
  0x2d   :  { %v152_v27 = vld [vmem:[%s385_s2] ss:$0 sm:$0xff] }
  0x2e   :  { %210 = vmatpush3.bf16.msra.mxu0 %v209_v7  ;;  %p289_p6 = pnand %p288_p5, %p282_p2 }
  0x2f   :  { %211 = vmatprep.subr.bf16.mxu0 %v313_v0 }
  0x32   :  { %213 = vmatpush3.bf16.msra.mxu0 %v212_v10 }
  0x33   :  { %214 = vmatprep.subr.bf16.mxu0 %v313_v0 }
  0x36   :  { %216 = vmatpush3.bf16.msra.mxu0 %v215_v13 }
  0x37   :  { %217 = vmatprep.subr.bf16.mxu0 %v313_v0 }
  0x3a   :  { %219 = vmatpush3.bf16.msra.mxu0 %v218_v16 }
  0x3b   :  { %220 = vmatprep.subr.bf16.mxu0 %v313_v0 }
  0x3e   :  { %222 = vmatpush3.bf16.msra.mxu0 %v221_v19 }
  0x3f   :  { %223 = vmatprep.subr.bf16.mxu0 %v313_v0 }
  0x42   :  { %225 = vmatpush3.bf16.msra.mxu0 %v224_v22 }
  0x43   :  { %226 = vmatprep.subr.bf16.mxu0 %v313_v0 }
  0x46   :  { %228 = vmatpush3.bf16.msra.mxu0 %v227_v25 }
  0x49   :  { %203 = vmatmul.mubr.f32.vlgmr.msra.gmra.mrb[0].mxu0 %v41_v26 }
 0x11c   :  { %v131_v28 = vpop.f32.mrb[0].mxu0 }
 0x11d   :  { %v132_v29 = vadd.f32 %v152_v27, %v131_v28  ;;  %v204_v30 = vpop.f32.mrb[1].mxu0 }
 0x11f   :  { %135 = vst [vmem:[#allocation7] sm:$0xff] %v132_v29 }
 0x120   :  { %292 = shalt.err (!%p289_p6)
}
 0x121   :  { %s293_s16 = scalar_lea.hbm %s386_s3, 128 }
 0x122   :  { %p294_p7 = scmp.ne.s32.totalorder %s386_s3, %s293_s16  ;;  %p297_p8 = scmp.lt.u32.totalorder %s293_s16, %s386_s3 }
 0x124   :  { %p299_p9 = pnand %p297_p8, %p294_p7 }
 0x126   :  { %302 = shalt.err (!%p299_p9)
}
 0x127   :  { %145 = dma.vmem_to_hbm [thread:$0]  %s143_s12, 128, %s386_s3, [#allocation4]  }
 0x128   :  { %307 = dma.done.wait [#allocation4], 128  }
 0x129   :  { %308 = vsyncadd [#allocation4], 4294967168 }
 0x12a   :  { %149 = vsyncpa [#allocation3], 1 }
 0x12b   :  { %150 = vsyncpa [#allocation6], 1 }
 0x12c   :  { %151 = vsyncpa [#allocation4], 1 }

</bundles_post_ra>
